<compile_context>
chip_gen: v7x
topology: tpu7x:2x2x1
jax: 0.10.0
libtpu: 0.0.40
codegen_flags: <defaults>
</compile_context>

<pallas_src>
import functools

import jax
import jax.numpy as jnp
from jax import lax
from jax.experimental import pallas as pl
from jax.experimental.pallas import tpu as pltpu


# ----------------------------- module metadata -----------------------------
E_MAP_DEFAULT = {
    "bond_type": ["misc", "SINGLE", "DOUBLE", "TRIPLE", "AROMATIC"],
    "stereo": ["STEREONONE", "STEREOZ", "STEREOE", "STEREOCIS",
               "STEREOTRANS", "STEREOANY"],
    "is_conjugated": [False, True],
}


def get_bond_feature_dims():
    return [len(v) + 10 for v in (E_MAP_DEFAULT["bond_type"],
                                  E_MAP_DEFAULT["stereo"],
                                  E_MAP_DEFAULT["is_conjugated"])]


def _round_up(x, m):
    return ((x + m - 1) // m) * m


def _cdiv(a, b):
    return -(-a // b)


def xavier_uniform(key, shape):
    # torch.nn.init.xavier_uniform_ on a [num_emb, emb_dim] weight:
    # fan_out = num_emb (dim 0), fan_in = emb_dim (dim 1), gain = 1.
    fan_out, fan_in = shape
    bound = (6.0 / (fan_in + fan_out)) ** 0.5
    return jax.random.uniform(key, shape, jnp.float32, -bound, bound)


def make_bond_encoder_params(key, emb_dim, table_dtype=jnp.bfloat16):
    """Builds the concatenated, row-padded embedding table (once, off the hot
    path) and the per-feature row offsets.

    table_dtype=bf16 is the recommended MXU path; the cast rounds embedding
    values to bf16 (~3 significant decimal digits) — pass jnp.float32 if the
    model cannot tolerate that.
    """
    dims = get_bond_feature_dims()            # [15, 16, 12]
    keys = jax.random.split(key, len(dims))
    tables = [xavier_uniform(k, (d, emb_dim)) for k, d in zip(keys, dims)]
    table = jnp.concatenate(tables, axis=0)   # [43, emb_dim] f32
    nrows = table.shape[0]
    nrows_pad = _round_up(nrows, 8)           # 43 -> 48 (clean sublane tiles)
    table_p = jnp.zeros((nrows_pad, emb_dim), table_dtype)
    table_p = table_p.at[:nrows].set(table.astype(table_dtype))

    offsets, acc = [], 0
    for d in dims:
        offsets.append(acc)
        acc += d
    return table_p, tuple(offsets)


# -------------------------------- kernel -----------------------------------
def _bond_encoder_kernel(table_ref, idx_ref, out_ref, *, offsets):
    # table_ref: [R_pad, D]  (bf16 or f32) — full table, resident every step
    # idx_ref:   [TE, F] i32 — raw feature indices (offsets folded in here)
    # out_ref:   [TE, D] f32
    table = table_ref[...]
    idx = idx_ref[...]
    te, nfeat = idx.shape
    nrows = table.shape[0]

    row_ids = lax.broadcasted_iota(jnp.int32, (te, nrows), 1)   # [TE, R_pad]

    # Disjoint per-feature row ranges -> boolean OR over features equals the
    # summed one-hot.  Offsets are static Python ints (free constant folds).
    hit = None
    for f in range(nfeat):
        col = idx[:, f:f + 1]
        if offsets[f]:
            col = col + offsets[f]
        eq = row_ids == col
        hit = eq if hit is None else jnp.logical_or(hit, eq)

    # {0,1} is exact in bf16, so casting the one-hot to the table dtype keeps
    # the single-pass MXU path; f32 accumulate via preferred_element_type.
    onehot = hit.astype(table.dtype)
    prec = (lax.Precision.HIGHEST if table.dtype == jnp.float32
            else lax.Precision.DEFAULT)
    out_ref[...] = jnp.dot(onehot, table,
                           preferred_element_type=jnp.float32,
                           precision=prec)


# ------------------------------- wrapper ------------------------------------
def _choose_edge_tiling(num_edges, tile_e_max):
    num_tiles = _cdiv(num_edges, tile_e_max)
    # Keep >= 2 grid steps for non-tiny inputs so ("parallel",) can use both
    # TensorCores on v7x.
    if num_edges >= 256:
        num_tiles = max(num_tiles, 2)
    tile_e = _round_up(_cdiv(num_edges, num_tiles), 8)   # balanced, sublane-clean
    grid_e = _cdiv(num_edges, tile_e)
    return tile_e, grid_e


def bond_encoder_on_features(edge_attr, table, offsets, *, tile_e_max=2048):
    """edge_attr: [E, F] integer array -> [E, emb_dim] float32.

    tile_e_max: upper bound on edges per grid step.  Default 2048: output
    double-buffers are 2048*emb_dim*4*2 bytes (8 MiB at emb_dim=512), under
    v5e's 16 MiB scoped-VMEM default and comfortable on v6e/v7x.  On v7x you
    may raise to 4096 together with pltpu.CompilerParams(vmem_limit_bytes=...).
    """
    num_edges, nfeat = edge_attr.shape
    nrows_pad, emb_dim = table.shape

    idx = edge_attr.astype(jnp.int32)        # no-op if already int32
    tile_e, grid_e = _choose_edge_tiling(num_edges, tile_e_max)

    kernel = functools.partial(
        _bond_encoder_kernel, offsets=tuple(int(o) for o in offsets))

    # Output / idx last dims equal the full array dims (legal TPU block), so no
    # column padding, no e_pad padding and no epilogue slice copy.  The partial
    # boundary tile (when tile_e does not divide E) uses Pallas' bounded reads
    # and masked writes.
    # Note: the table BlockSpec has a constant index_map, so it stays resident;
    # its second pipeline buffer is only ~tens of KB of VMEM waste.
    out = pl.pallas_call(
        kernel,
        out_shape=jax.ShapeDtypeStruct((num_edges, emb_dim), jnp.float32),
        grid=(grid_e,),
        in_specs=[
            pl.BlockSpec((nrows_pad, emb_dim), lambda i: (0, 0)),  # full table
            pl.BlockSpec((tile_e, nfeat), lambda i: (i, 0)),       # edge tile
        ],
        out_specs=pl.BlockSpec((tile_e, emb_dim), lambda i: (i, 0)),
        compiler_params=pltpu.CompilerParams(
            dimension_semantics=("parallel",)),
    )(table, idx)
    return out


def bond_encoder_forward(batch, table, offsets, *, model="GCMN"):
    """Mirrors BondEncoder.forward.  torch.flatten(start_dim=1) is a no-op on
    the 2-D [E, emb_dim] encoding; indices stay int32 (TPU has no native i64
    vector path; the values fit easily)."""
    batch = dict(batch)
    if model == "GCMN":
        enc = bond_encoder_on_features(batch["edge_features"], table, offsets)
        batch["edge_features"] = enc.reshape(enc.shape[0], -1)
    else:
        for key in ("parent_edge_features", "parent_light_edge_features"):
            enc = bond_encoder_on_features(batch[key], table, offsets)
            batch[key] = enc.reshape(enc.shape[0], -1)
    return batch


# -------------------------------- reference ---------------------------------
def _reference(edge_attr, table, offsets):
    t = table.astype(jnp.float32)
    out = 0
    for f in range(edge_attr.shape[1]):
        out = out + t[edge_attr[:, f] + offsets[f]]
    return out


if __name__ == "__main__":
    key = jax.random.PRNGKey(0)
    k_param, k_idx = jax.random.split(key)
    dims = get_bond_feature_dims()

    # --- test 1: small single-step grid through the module's forward ---
    emb_dim = 32
    num_edges = 10
    table, offsets = make_bond_encoder_params(k_param, emb_dim)

    cols = [
        jax.random.randint(jax.random.fold_in(k_idx, i), (num_edges, 1), 0, d)
        for i, d in enumerate(dims)
    ]
    edge_features = jnp.concatenate(cols, axis=1).astype(jnp.int32)  # [E, 3]

    batch = {"edge_features": edge_features}
    out_batch = bond_encoder_forward(batch, table, offsets)
    result = jax.block_until_ready(out_batch["edge_features"])

    expected = _reference(edge_features, table, offsets)
    assert result.shape == (num_edges, emb_dim)
    assert jnp.allclose(result, expected, atol=1e-5), "mismatch vs reference"

    # --- test 2: multi-step grid with a partial boundary tile ---
    # E=300, tile_e_max=128 -> balanced tile_e=104, grid=3, last tile partial.
    emb_dim2, num_edges2 = 64, 300
    table2, offsets2 = make_bond_encoder_params(
        jax.random.fold_in(k_param, 7), emb_dim2)
    cols2 = [
        jax.random.randint(jax.random.fold_in(k_idx, 100 + i),
                           (num_edges2, 1), 0, d)
        for i, d in enumerate(dims)
    ]
    edge_features2 = jnp.concatenate(cols2, axis=1).astype(jnp.int32)
    result2 = jax.block_until_ready(
        bond_encoder_on_features(edge_features2, table2, offsets2,
                                 tile_e_max=128))
    expected2 = _reference(edge_features2, table2, offsets2)
    assert result2.shape == (num_edges2, emb_dim2)
    assert jnp.allclose(result2, expected2, atol=1e-5), "mismatch (tiled)"

    print("KERNEL_OK")
</pallas_src>

<mosaic_0001>
module attributes {stable_mosaic.version = 11 : i64} {
  func.func @_bond_encoder_kernel(%arg0: i32, %arg1: memref<48x32xbf16, #tpu.memory_space<vmem>>, %arg2: memref<16x3xi32, #tpu.memory_space<vmem>>, %arg3: memref<16x32xf32, #tpu.memory_space<vmem>>) attributes {dimension_semantics = [#tpu.dimension_semantics<parallel>], iteration_bounds = array<i64: 1>, scalar_prefetch = 0 : i64, scratch_operands = 0 : i64, tpu.core_type = #tpu.core_type<tc>, window_params = [{pipeline_mode = #tpu.pipeline_mode<synchronous>, transform_indices = @transform_0, window_bounds = array<i64: 48, 32>}, {transform_indices = @transform_1, window_bounds = array<i64: 16, 3>}, {transform_indices = @transform_2, window_bounds = array<i64: 16, 32>}]} {
    %c0 = arith.constant 0 : index
    %c0_0 = arith.constant 0 : index
    %0 = vector.load %arg1[%c0, %c0_0] : memref<48x32xbf16, #tpu.memory_space<vmem>>, vector<48x32xbf16>
    %c0_1 = arith.constant 0 : index
    %c0_2 = arith.constant 0 : index
    %1 = vector.load %arg2[%c0_1, %c0_2] : memref<16x3xi32, #tpu.memory_space<vmem>>, vector<16x3xi32>
    %2 = tpu.iota {dimensions = array<i32: 1>} : vector<16x48xi32>
    %3 = vector.extract_strided_slice %1 {offsets = [0, 0], sizes = [16, 1], strides = [1, 1]} : vector<16x3xi32> to vector<16x1xi32>
    %4 = vector.broadcast %3 : vector<16x1xi32> to vector<16x48xi32>
    %5 = arith.cmpi eq, %2, %4 : vector<16x48xi32>
    %6 = vector.extract_strided_slice %1 {offsets = [0, 1], sizes = [16, 1], strides = [1, 1]} : vector<16x3xi32> to vector<16x1xi32>
    %c15_i32 = arith.constant 15 : i32
    %7 = vector.broadcast %c15_i32 : i32 to vector<16x1xi32>
    %8 = arith.addi %6, %7 : vector<16x1xi32>
    %9 = vector.broadcast %8 : vector<16x1xi32> to vector<16x48xi32>
    %10 = arith.cmpi eq, %2, %9 : vector<16x48xi32>
    %11 = arith.ori %5, %10 : vector<16x48xi1>
    %12 = vector.extract_strided_slice %1 {offsets = [0, 2], sizes = [16, 1], strides = [1, 1]} : vector<16x3xi32> to vector<16x1xi32>
    %c31_i32 = arith.constant 31 : i32
    %13 = vector.broadcast %c31_i32 : i32 to vector<16x1xi32>
    %14 = arith.addi %12, %13 : vector<16x1xi32>
    %15 = vector.broadcast %14 : vector<16x1xi32> to vector<16x48xi32>
    %16 = arith.cmpi eq, %2, %15 : vector<16x48xi32>
    %17 = arith.ori %11, %16 : vector<16x48xi1>
    %18 = arith.extui %17 : vector<16x48xi1> to vector<16x48xi32>
    %19 = arith.sitofp %18 : vector<16x48xi32> to vector<16x48xf32>
    %20 = arith.truncf %19 : vector<16x48xf32> to vector<16x48xbf16>
    %cst = arith.constant dense<0.000000e+00> : vector<16x32xf32>
    %21 = tpu.matmul %20, %0, %cst {dimension_numbers = #tpu.dot_dimension_numbers<[1], [0], [0], [1], [0, 0, 1, 1], [], []>} : vector<16x48xbf16>, vector<48x32xbf16>, vector<16x32xf32> -> vector<16x32xf32>
    %c0_3 = arith.constant 0 : index
    %c0_4 = arith.constant 0 : index
    %22 = vector.load %arg3[%c0_3, %c0_4] : memref<16x32xf32, #tpu.memory_space<vmem>>, vector<16x32xf32>
    tpu.vector_store %arg3[%c0_3, %c0_4], %21 {strides = array<i32>} : memref<16x32xf32, #tpu.memory_space<vmem>>, vector<16x32xf32>,
    return
  }
  func.func @transform_0(%arg0: i32) -> (i32, i32) {
    %c0_i32 = arith.constant 0 : i32
    %c0_i32_0 = arith.constant 0 : i32
    %c0_i32_1 = arith.constant 0 : i32
    return %c0_i32, %c0_i32_0 : i32, i32
  }
  func.func @transform_1(%arg0: i32) -> (i32, i32) {
    %c0_i32 = arith.constant 0 : i32
    %c0_i32_0 = arith.constant 0 : i32
    return %arg0, %c0_i32 : i32, i32
  }
  func.func @transform_2(%arg0: i32) -> (i32, i32) {
    %c0_i32 = arith.constant 0 : i32
    %c0_i32_0 = arith.constant 0 : i32
    return %arg0, %c0_i32 : i32, i32
  }
}

</mosaic_0001>

<bundles_post_ra>
// kernel: tpu_custom_call.1
= control target key start
LH: loop header
LB: loop body
LE: loop exit
PB: predicated region body
PF: predicated region fallthrough
CT: control target
= control target key end

     0   :  { %v201_v2 = vmov 0   ;;  %v202_v3 = vmov 1   ;;  %s251_s0 = inlined_call_operand.vmem [shape: bf16[48,32], index: 0, kind: input, shape index: {}]   ;;  %s252_s1 = inlined_call_operand.vmem [shape: s32[10,3], index: 1, kind: input, shape index: {}]   ;;  %s253_s2 = inlined_call_operand.hbm [shape: f32[10,32], index: 2, kind: output, shape index: {}]  }
   0x1   :  { %v19_v0 = vld [vmem:[%s252_s1] sm:$0xff]  ;;  %v20_v1 = vld [vmem:[%s252_s1 + $0x8] sm:$0xff]  ;;  %170 = vset.pattern.permute.xlu0 %v201_v2  ;;  %171 = vset.pattern.permute.xlu1 %v202_v3 }
   0x2   :  { %v31_v4 = vadd.s32 15, %v19_v0  ;;  %24 = vperm.xlu0 %170, %v19_v0   ;;  %v32_v5 = vadd.s32 15, %v20_v1  ;;  %v174_v6 = vld [vmem:[%s251_s0] sm:$0xff]  }
   0x4   :  { %34 = vperm.xlu1 %171, %v31_v4  }
   0x5   :  { %7 = vsyncpa [#allocation3], 0  ;;  %v203_v7 = vmov 0.0   ;;  %v43_v8 = vadd.s32 31, %v19_v0  ;;  %v44_v9 = vadd.s32 31, %v20_v1  ;;  %v175_v10 = vld [vmem:[%s251_s0 + $0x8] sm:$0xff]   ;;  %v21_v13 = vlaneseq }
   0x6   :  { %152 = vmatprep.subr.bf16.mxu0 %v203_v7  ;;  %27 = vperm.xlu0 %170, %v20_v1   ;;  %v204_v11 = vmov 2   ;;  %v176_v12 = vld [vmem:[%s251_s0 + $0x10] sm:$0xff]   ;;  %vm205_vm0 = vmmov 0   ;;  %vm78_vm11 = vcmask 392192   ;;  %s206_s0 = smov [#allocation2]   ;;  %vm123_vm12 = vcmask 261120  }
   0x7   :  { %153 = vmatpush3.bf16.msra.mxu0 %v174_v6  ;;  %158 = vmatprep.mubr.msk.bf16.mxu0 %vm205_vm0, %v203_v7  ;;  %v22_v16 = vand.u32 127, %v21_v13  ;;  %s131_s18 = sshll.u32 %s206_s0, 4  ;;  %s132_s18 = int_to_ptr.vmem [resolvable:$true] %s131_s18 }
   0x8   :  { %37 = vperm.xlu1 %171, %v32_v5   ;;  %154 = vmatprep.subr.bf16.mxu0 %v203_v7  ;;  %s177_s19 = scalar_lea.vmem %s132_s18, 256  ;;  %p182_p1 = scmp.lt.s32.totalorder %s132_s18, %s132_s18 }
   0x9   :  { %p178_p0 = scmp.ne.s32.totalorder %s132_s18, %s177_s19  ;;  %p183_p2 = scmp.lt.s32.totalorder %s177_s19, %s177_s19 }
   0xa   :  { %172 = vset.pattern.permute.xlu0 %v204_v11 }
   0xb   :  { %155 = vmatpush3.bf16.msra.mxu0 %v175_v10  ;;  %46 = vperm.xlu0 %172, %v43_v8   ;;  %p184_p3 = por %p183_p2, %p182_p1 }
   0xc   :  { %173 = vset.pattern.permute.xlu1 %v204_v11  ;;  %156 = vmatprep.subr.bf16.mxu0 %v203_v7 }
   0xd   :  { %49 = vperm.xlu1 %173, %v44_v9   ;;  %p185_p4 = pnand %p184_p3, %p178_p0 }
   0xf   :  { %157 = vmatpush3.bf16.msra.mxu0 %v176_v12 }
  0x81   :  { %v25_v14 = vpop.permute.xlu0 %24 }
  0x82   :  { %vm29_vm1 = vcmp.eq.s32.totalorder %v22_v16, %v25_v14 }
  0x83   :  { %v35_v15 = vpop.permute.xlu1 %34 }
  0x84   :  { %vm39_vm2 = vcmp.eq.s32.totalorder %v22_v16, %v35_v15 }
  0x85   :  { %v28_v17 = vpop.permute.xlu0 %27  ;;  %vm41_vm5 = vmor %vm29_vm1, %vm39_vm2 }
  0x86   :  { %vm30_vm3 = vcmp.eq.s32.totalorder %v22_v16, %v28_v17 }
  0x87   :  { %v38_v18 = vpop.permute.xlu1 %37 }
  0x88   :  { %vm40_vm4 = vcmp.eq.s32.totalorder %v22_v16, %v38_v18 }
  0x89   :  { %vm42_vm6 = vmor %vm30_vm3, %vm40_vm4 }
  0x8a   :  { %v47_v19 = vpop.permute.xlu0 %46 }
  0x8b   :  { %vm51_vm7 = vcmp.eq.s32.totalorder %v22_v16, %v47_v19 }
  0x8c   :  { %v50_v20 = vpop.permute.xlu1 %49  ;;  %vm53_vm8 = vmor %vm41_vm5, %vm51_vm7 }
  0x8d   :  { %vm52_vm9 = vcmp.eq.s32.totalorder %v22_v16, %v50_v20  ;;  %v142_v21 = vsel %vm53_vm8, 1.0, %v203_v7 }
  0x8e   :  { %vm54_vm10 = vmor %vm42_vm6, %vm52_vm9 }
  0x8f   :  { %v143_v22 = vsel %vm54_vm10, 1.0, %v203_v7 }
  0x90   :  { %v59_v23 = vpack.c.bf16 %v143_v22, %v142_v21 }
  0x92   :  { %159 = vmatmul.mubr.msk.bf16.vlgmr.msra.gmra.mrb[0].mxu0 %vm78_vm11, %v59_v23 }
 0x165   :  { %v116_v24 = vpop.f32.mrb[0].mxu0 }
 0x166   :  { %124 = vst.msk [vmem:[#allocation2] sm:$0xff] %vm123_vm12, %v116_v24  ;;  %v160_v25 = vpop.f32.mrb[1].mxu0 }
 0x167   :  { %v119_v26 = vpop.f32.mrb[2].mxu0 }
 0x168   :  { %125 = vst.msk [vmem:[#allocation2 + $0x8] sm:$0xff] %vm123_vm12, %v119_v26  ;;  %v161_v27 = vpop.f32.mrb[3].mxu0 }
 0x169   :  { %188 = shalt.err (!%p185_p4)
}
 0x16a   :  { %s189_s22 = scalar_lea.hbm %s253_s2, 256 }
 0x16b   :  { %p190_p5 = scmp.ne.s32.totalorder %s253_s2, %s189_s22  ;;  %p193_p6 = scmp.lt.u32.totalorder %s189_s22, %s253_s2 }
 0x16d   :  { %p195_p7 = pnand %p193_p6, %p190_p5 }
 0x16f   :  { %198 = shalt.err (!%p195_p7)
}
 0x170   :  { %s207_s27 = smov 128   ;;  %s208_s28 = smov 8  }
 0x171   :  { %137 = dma.vmem_to_hbm [thread:$0]  %s132_s18, 256, %s253_s2, [#allocation3], %s207_s27, %s207_s27, %s208_s28  }
 0x172   :  { %199 = dma.done.wait [#allocation3], 256  }
 0x173   :  { %200 = vsyncadd [#allocation3], 4294967040 }
 0x174   :  { %141 = vsyncpa [#allocation3], 1 }

</bundles_post_ra>
